<compile_context>
chip_gen: v7x
topology: tpu7x:2x2x1
jax: 0.10.0
libtpu: 0.0.40
codegen_flags: <defaults>
</compile_context>

<pallas_src>
import jax
import jax.numpy as jnp
from jax.experimental import pallas as pl
from jax.experimental.pallas import tpu as pltpu


def _swish_kernel(x_ref, o_ref):
    xf = x_ref[...].astype(jnp.float32)
    # swish(x) = x * sigmoid(x) = 0.5*x*(1 + tanh(0.5*x))
    half_x = 0.5 * xf
    o_ref[...] = (half_x + half_x * jnp.tanh(half_x)).astype(o_ref.dtype)


def _round_up(n: int, m: int) -> int:
    return ((n + m - 1) // m) * m


def _tpu_config():
    """Per-generation (target_block_bytes, vmem_budget_bytes, min_grid_steps)."""
    kind = ""
    try:
        kind = jax.devices()[0].device_kind.lower()
    except Exception:
        pass
    if "v7" in kind or "tpu7" in kind:
        # v7x: 32 MiB scoped VMEM (of 64 MiB physical) per TC, fastest HBM so
        # the ~0.35us/step overhead is relatively largest; 2 TCs per chip so
        # medium inputs need >= 8 steps to feed both cores.
        return 6 << 20, 26 << 20, 8
    if "v6" in kind or "trillium" in kind:
        # v6e: 32 MiB default scoped VMEM, single TC.
        return 5 << 20, 26 << 20, 4
    if "v5e" in kind or "v5 lite" in kind or "v5lite" in kind:
        # v5e: 16 MiB default scoped VMEM, slower HBM -> step overhead already small.
        return 3 << 20, 12 << 20, 4
    # Unknown generation (v4/v5p/interpret/...): conservative sizing.
    return 3 << 20, 12 << 20, 4


def _block_spec(block_shape, index_map, nbuf):
    """BlockSpec with optional deeper pipelining (graceful fallback)."""
    if nbuf > 2 and hasattr(pl, "Buffered"):
        try:
            return pl.BlockSpec(block_shape, index_map, pipeline_mode=pl.Buffered(nbuf))
        except TypeError:  # jax without pipeline_mode on BlockSpec
            pass
    return pl.BlockSpec(block_shape, index_map)


def swish(x: jax.Array) -> jax.Array:
    """Elementwise swish. Works for any shape; hot path runs in Pallas."""
    orig_shape = x.shape
    dtype = x.dtype
    total = x.size
    if total == 0:
        return x

    target_block_bytes, vmem_budget, min_steps = _tpu_config()

    # Widest lane-dense last dim that divides the flat length (conv activations
    # are virtually always divisible by 128, usually by 1024).
    lane = None
    for cand in (1024, 512, 256, 128):
        if total % cand == 0:
            lane = cand
            break

    x_flat = jnp.ravel(x)
    tail = None
    if lane is None:
        # Unaligned: Pallas over the 128-aligned prefix only; finish the tiny
        # (<128 element) tail with plain jnp. Avoids full-array pad + slice
        # round trips (each a full extra HBM read+write pass).
        aligned = (total // 128) * 128
        if aligned == 0:
            xf = x_flat.astype(jnp.float32)
            return (xf * jax.nn.sigmoid(xf)).astype(dtype).reshape(orig_shape)
        lane = 128
        for cand in (1024, 512, 256):
            if aligned % cand == 0:
                lane = cand
                break
        tail = x_flat[aligned:]
        x_flat = x_flat[:aligned]
    else:
        aligned = total

    rows = aligned // lane
    x2d = x_flat.reshape(rows, lane)

    itemsize = jnp.dtype(dtype).itemsize
    # Block sizing:
    #  * as large as the per-generation target allows (amortizes the ~0.35us
    #    per-grid-step overhead), within the VMEM budget at 2x(in+out) buffers,
    #  * but at least `min_steps` grid steps for medium/large inputs so input
    #    prefetch overlaps output writeback and (v7x) both TCs get work,
    #  * row tile a multiple of 32 (clean f32/bf16/int8 sublane packing),
    #  * never much larger than the array itself.
    block_bytes_target = min(target_block_bytes, vmem_budget // 4)
    br = max(32, (block_bytes_target // (lane * itemsize)) // 32 * 32)
    br = min(br, max(32, _round_up(-(-rows // min_steps), 32)))
    br = min(br, _round_up(rows, 32))
    grid_steps = pl.cdiv(rows, br)

    # Third pipeline buffer (in + out) only when blocks are small enough that
    # 6 buffers still fit the budget: hides writeback latency on medium inputs.
    block_bytes = br * lane * itemsize
    nbuf = 3 if (grid_steps >= 3 and 6 * block_bytes <= vmem_budget) else 2

    out2d = pl.pallas_call(
        _swish_kernel,
        out_shape=jax.ShapeDtypeStruct((rows, lane), dtype),
        grid_spec=pltpu.PrefetchScalarGridSpec(
            num_scalar_prefetch=0,
            grid=(grid_steps,),
            in_specs=[_block_spec((br, lane), lambda i: (i, 0), nbuf)],
            out_specs=_block_spec((br, lane), lambda i: (i, 0), nbuf),
        ),
        compiler_params=pltpu.CompilerParams(
            dimension_semantics=("parallel",),  # shards grid across TCs on v7x
        ),
    )(x2d)

    out_flat = out2d.reshape(-1)
    if tail is not None:
        tail_f = tail.astype(jnp.float32)
        tail_out = (tail_f * jax.nn.sigmoid(tail_f)).astype(dtype)
        out_flat = jnp.concatenate([out_flat, tail_out])
    return out_flat.reshape(orig_shape)


def _check(x, tol):
    out = jax.block_until_ready(swish(x))
    xf = x.astype(jnp.float32)
    ref = xf * jax.nn.sigmoid(xf)
    assert out.shape == x.shape and out.dtype == x.dtype
    err = float(jnp.max(jnp.abs(out.astype(jnp.float32) - ref)))
    assert err < tol, f"max abs err {err} >= {tol}"


if __name__ == "__main__":
    key = jax.random.PRNGKey(0)
    k0, k1, k2, k3 = jax.random.split(key, 4)

    # NCHW input like the PyTorch module would see (primary check).
    x = jax.random.normal(k0, (2, 4, 16, 16), dtype=jnp.float32)
    _check(x, 1e-5)

    # Unaligned shape exercising the aligned-prefix + jnp-tail path.
    x_odd = jax.random.normal(k1, (3, 5, 7, 11), dtype=jnp.float32)
    _check(x_odd, 1e-5)

    # Larger shape exercising a multi-step grid (and the deeper pipeline path).
    x_big = jax.random.normal(k2, (4, 32, 32, 64), dtype=jnp.float32)
    _check(x_big, 1e-5)

    # bf16 input with a looser tolerance (per review's correctness note).
    x_bf16 = jax.random.normal(k3, (2, 4, 16, 16), dtype=jnp.bfloat16)
    _check(x_bf16, 5e-2)

    print("KERNEL_OK")
</pallas_src>

<mosaic_0001>
module attributes {stable_mosaic.version = 11 : i64} {
  func.func @_swish_kernel(%arg0: i32, %arg1: memref<32x1024xf32, #tpu.memory_space<vmem>>, %arg2: memref<32x1024xf32, #tpu.memory_space<vmem>>) attributes {dimension_semantics = [#tpu.dimension_semantics<parallel>], iteration_bounds = array<i64: 1>, scalar_prefetch = 0 : i64, scratch_operands = 0 : i64, tpu.core_type = #tpu.core_type<tc>, window_params = [{transform_indices = @transform_0, window_bounds = array<i64: 32, 1024>}, {transform_indices = @transform_1, window_bounds = array<i64: 32, 1024>}]} {
    %c0 = arith.constant 0 : index
    %c0_0 = arith.constant 0 : index
    %0 = vector.load %arg1[%c0, %c0_0] : memref<32x1024xf32, #tpu.memory_space<vmem>>, vector<32x1024xf32>
    %cst = arith.constant 5.000000e-01 : f32
    %1 = vector.broadcast %cst : f32 to vector<32x1024xf32>
    %2 = arith.mulf %1, %0 : vector<32x1024xf32>
    %3 = math.tanh %2 : vector<32x1024xf32>
    %4 = arith.mulf %2, %3 : vector<32x1024xf32>
    %5 = arith.addf %2, %4 : vector<32x1024xf32>
    %c0_1 = arith.constant 0 : index
    %c0_2 = arith.constant 0 : index
    %6 = vector.load %arg2[%c0_1, %c0_2] : memref<32x1024xf32, #tpu.memory_space<vmem>>, vector<32x1024xf32>
    tpu.vector_store %arg2[%c0_1, %c0_2], %5 {strides = array<i32>} : memref<32x1024xf32, #tpu.memory_space<vmem>>, vector<32x1024xf32>,
    return
  }
  func.func @transform_0(%arg0: i32) -> (i32, i32) {
    %c0_i32 = arith.constant 0 : i32
    %c0_i32_0 = arith.constant 0 : i32
    return %arg0, %c0_i32 : i32, i32
  }
  func.func @transform_1(%arg0: i32) -> (i32, i32) {
    %c0_i32 = arith.constant 0 : i32
    %c0_i32_0 = arith.constant 0 : i32
    return %arg0, %c0_i32 : i32, i32
  }
}

</mosaic_0001>

<bundles_post_ra>
// kernel: tpu_custom_call.1
= control target key start
LH: loop header
LB: loop body
LE: loop exit
PB: predicated region body
PF: predicated region fallthrough
CT: control target
= control target key end

     0   :  { %6 = vsyncpa [#allocation3], 0  ;;  %s542_s0 = inlined_call_operand.hbm [shape: f32[2,1024], index: 0, kind: input, shape index: {}]   ;;  %s543_s1 = inlined_call_operand.hbm [shape: f32[2,1024], index: 1, kind: output, shape index: {}]  }
   0x1   :  { %7 = vsyncpa [#allocation4], 0 }
   0x2   :  { %12 = vsyncadd [#allocation3], 3840  ;;  %s348_s6 = smov [#allocation2]   ;;  %s300_s10 = scalar_lea.hbm %s542_s0, 256 }
   0x3   :  { %s13_s7 = sshll.u32 %s348_s6, 4  ;;  %p301_p0 = scmp.ne.s32.totalorder %s542_s0, %s300_s10  ;;  %s14_s7 = int_to_ptr.vmem [resolvable:$true] %s13_s7 }
   0x4   :  { %p304_p1 = scmp.lt.u32.totalorder %s300_s10, %s542_s0 }
   0x6   :  { %p306_p2 = pnand %p304_p1, %p301_p0 }
   0x8   :  { %309 = shalt.err (!%p306_p2)
}
   0x9   :  { %s310_s15 = scalar_lea.vmem %s14_s7, 256  ;;  %s314_s16 = scalar_lea.vmem %s14_s7, 4096 }
   0xa   :  { %p311_p3 = scmp.ne.s32.totalorder %s14_s7, %s310_s15  ;;  %p315_p4 = scmp.lt.s32.totalorder %s14_s7, %s14_s7 }
   0xb   :  { %p316_p5 = scmp.lt.s32.totalorder %s314_s16, %s310_s15 }
   0xd   :  { %p317_p6 = por %p316_p5, %p315_p4 }
   0xf   :  { %p318_p7 = pnand %p317_p6, %p311_p3 }
  0x11   :  { %321 = shalt.err (!%p318_p7)
}
  0x12   :  { %s349_s17 = smov 256   ;;  %s350_s18 = smov 16  }
  0x13   :  { %19 = dma.hbm_to_vmem [thread:$0]  %s542_s0, 256, %s14_s7, [#allocation3], %s349_s17, %s349_s17, %s350_s18  }
  0x14   :  { %344 = dma.done.wait [#allocation3], 4096  }
  0x15   :  { %345 = vsyncadd [#allocation3], 4294963200  ;;  %v23_v0 = vld [vmem:[#allocation2] sm:$0xff]  ;;  %v24_v1 = vld [vmem:[#allocation2 + $0x8] sm:$0xff] }
  0x16   :  { %v25_v2 = vld [vmem:[#allocation2 + $0x10] sm:$0xff]  ;;  %v55_v3 = vmul.f32 0.5, %v23_v0  ;;  %v56_v4 = vmul.f32 0.5, %v24_v1  ;;  %v26_v6 = vld [vmem:[#allocation2 + $0x18] sm:$0xff]  ;;  %v27_v7 = vld [vmem:[#allocation2 + $0x20] sm:$0xff] }
  0x17   :  { %v377_v5 = vmul.f32 0.5, %v25_v2  ;;  %v28_v8 = vld [vmem:[#allocation2 + $0x28] sm:$0xff]  ;;  %v379_v9 = vmul.f32 0.5, %v26_v6  ;;  %v29_v10 = vld [vmem:[#allocation2 + $0x30] sm:$0xff]  ;;  %v381_v11 = vmul.f32 0.5, %v27_v7  ;;  %v30_v12 = vld [vmem:[#allocation2 + $0x38] sm:$0xff] }
  0x18   :  { %236 = vtanh.f32 %v55_v3  ;;  %v383_v13 = vmul.f32 0.5, %v28_v8  ;;  %v31_v14 = vld [vmem:[#allocation2 + $0x40] sm:$0xff]  ;;  %v386_v15 = vmul.f32 0.5, %v29_v10  ;;  %v32_v16 = vld [vmem:[#allocation2 + $0x48] sm:$0xff]  ;;  %v389_v17 = vmul.f32 0.5, %v30_v12  ;;  %v33_v18 = vld [vmem:[#allocation2 + $0x50] sm:$0xff] }
  0x19   :  { %238 = vtanh.f32 %v56_v4  ;;  %v392_v19 = vmul.f32 0.5, %v31_v14  ;;  %v34_v20 = vld [vmem:[#allocation2 + $0x58] sm:$0xff]  ;;  %v395_v21 = vmul.f32 0.5, %v32_v16  ;;  %v35_v22 = vld [vmem:[#allocation2 + $0x60] sm:$0xff]  ;;  %v398_v23 = vmul.f32 0.5, %v33_v18  ;;  %v36_v24 = vld [vmem:[#allocation2 + $0x68] sm:$0xff] }
  0x1a   :  { %240 = vtanh.f32 %v377_v5  ;;  %v401_v25 = vmul.f32 0.5, %v34_v20  ;;  %v37_v26 = vld [vmem:[#allocation2 + $0x70] sm:$0xff]  ;;  %v404_v27 = vmul.f32 0.5, %v35_v22  ;;  %v38_v28 = vld [vmem:[#allocation2 + $0x78] sm:$0xff]  ;;  %v407_v29 = vmul.f32 0.5, %v36_v24  ;;  %v39_v30 = vld [vmem:[#allocation2 + $0x80] sm:$0xff] }
  0x1b   :  { %242 = vtanh.f32 %v379_v9  ;;  %v410_v32 = vmul.f32 0.5, %v37_v26  ;;  %v40_v33 = vld [vmem:[#allocation2 + $0x88] sm:$0xff]  ;;  %v413_v36 = vmul.f32 0.5, %v38_v28  ;;  %v41_v37 = vld [vmem:[#allocation2 + $0x90] sm:$0xff]  ;;  %v416_v40 = vmul.f32 0.5, %v39_v30  ;;  %v42_v41 = vld [vmem:[#allocation2 + $0x98] sm:$0xff] }
  0x1c   :  { %244 = vtanh.f32 %v381_v11  ;;  %v420_v45 = vmul.f32 0.5, %v40_v33  ;;  %v43_v46 = vld [vmem:[#allocation2 + $0xa0] sm:$0xff]  ;;  %v424_v50 = vmul.f32 0.5, %v41_v37  ;;  %v44_v51 = vld [vmem:[#allocation2 + $0xa8] sm:$0xff]  ;;  %v429_v55 = vmul.f32 0.5, %v42_v41  ;;  %v45_v56 = vld [vmem:[#allocation2 + $0xb0] sm:$0xff] }
  0x1d   :  { %246 = vtanh.f32 %v383_v13  ;;  %v434_v60 = vmul.f32 0.5, %v43_v46  ;;  %v46_v61 = vld [vmem:[#allocation2 + $0xb8] sm:$0xff]  ;;  %v439_v1 = vmul.f32 0.5, %v44_v51  ;;  %v47_v2 = vld [vmem:[#allocation2 + $0xc0] sm:$0xff]  ;;  %v444_v6 = vmul.f32 0.5, %v45_v56  ;;  %v48_v7 = vld [vmem:[#allocation2 + $0xc8] sm:$0xff] }
  0x1e   :  { %248 = vtanh.f32 %v386_v15  ;;  %v49_v12 = vld [vmem:[#allocation2 + $0xd0] sm:$0xff]  ;;  %v454_v18 = vmul.f32 0.5, %v47_v2  ;;  %v50_v20 = vld [vmem:[#allocation2 + $0xd8] sm:$0xff]  ;;  %v459_v26 = vmul.f32 0.5, %v48_v7  ;;  %v51_v28 = vld [vmem:[#allocation2 + $0xe0] sm:$0xff] }
  0x1f   :  { %250 = vtanh.f32 %v389_v17  ;;  %v464_v33 = vmul.f32 0.5, %v49_v12 }
  0x20   :  { %252 = vtanh.f32 %v392_v19 }
  0x21   :  { %254 = vtanh.f32 %v395_v21 }
  0x22   :  { %v237_v31 = vpop.eup %236  ;;  %256 = vtanh.f32 %v398_v23 }
  0x23   :  { %v239_v34 = vpop.eup %238  ;;  %v119_v35 = vmul.f32 %v237_v31, %v55_v3  ;;  %258 = vtanh.f32 %v401_v25 }
  0x24   :  { %v241_v38 = vpop.eup %240  ;;  %v120_v39 = vmul.f32 %v239_v34, %v56_v4  ;;  %260 = vtanh.f32 %v404_v27  ;;  %v52_v34 = vld [vmem:[#allocation2 + $0xe8] sm:$0xff] }
  0x25   :  { %v243_v42 = vpop.eup %242  ;;  %v151_v43 = vadd.f32 %v119_v35, %v55_v3  ;;  %v121_v44 = vmul.f32 %v241_v38, %v377_v5  ;;  %262 = vtanh.f32 %v407_v29  ;;  %v469_v38 = vmul.f32 0.5, %v50_v20 }
  0x26   :  { %v245_v47 = vpop.eup %244  ;;  %v152_v48 = vadd.f32 %v120_v39, %v56_v4  ;;  %v122_v49 = vmul.f32 %v243_v42, %v379_v9  ;;  %264 = vtanh.f32 %v410_v32  ;;  %v53_v39 = vld [vmem:[#allocation2 + $0xf0] sm:$0xff] }
  0x27   :  { %v247_v52 = vpop.eup %246  ;;  %183 = vst [vmem:[#allocation5] sm:$0xff] %v151_v43  ;;  %v153_v53 = vadd.f32 %v121_v44, %v377_v5  ;;  %v123_v54 = vmul.f32 %v245_v47, %v381_v11  ;;  %266 = vtanh.f32 %v413_v36  ;;  %v474_v43 = vmul.f32 0.5, %v51_v28  ;;  %v54_v44 = vld [vmem:[#allocation2 + $0xf8] sm:$0xff] }
  0x28   :  { %v249_v57 = vpop.eup %248  ;;  %184 = vst [vmem:[#allocation5 + $0x8] sm:$0xff] %v152_v48  ;;  %v154_v58 = vadd.f32 %v122_v49, %v379_v9  ;;  %v124_v59 = vmul.f32 %v247_v52, %v383_v13  ;;  %268 = vtanh.f32 %v416_v40  ;;  %v479_v48 = vmul.f32 0.5, %v52_v34 }
  0x29   :  { %v251_v62 = vpop.eup %250  ;;  %185 = vst [vmem:[#allocation5 + $0x10] sm:$0xff] %v153_v53  ;;  %v155_v63 = vadd.f32 %v123_v54, %v381_v11  ;;  %v125_v0 = vmul.f32 %v249_v57, %v386_v15  ;;  %270 = vtanh.f32 %v420_v45  ;;  %v449_v11 = vmul.f32 0.5, %v46_v61 }
  0x2a   :  { %v253_v3 = vpop.eup %252  ;;  %186 = vst [vmem:[#allocation5 + $0x18] sm:$0xff] %v154_v58  ;;  %v156_v4 = vadd.f32 %v124_v59, %v383_v13  ;;  %v126_v5 = vmul.f32 %v251_v62, %v389_v17  ;;  %272 = vtanh.f32 %v424_v50  ;;  %v484_v52 = vmul.f32 0.5, %v53_v39 }
  0x2b   :  { %v255_v8 = vpop.eup %254  ;;  %187 = vst [vmem:[#allocation5 + $0x20] sm:$0xff] %v155_v63  ;;  %v157_v9 = vadd.f32 %v125_v0, %v386_v15  ;;  %v127_v10 = vmul.f32 %v253_v3, %v392_v19  ;;  %274 = vtanh.f32 %v429_v55  ;;  %v489_v56 = vmul.f32 0.5, %v54_v44 }
  0x2c   :  { %v257_v14 = vpop.eup %256  ;;  %188 = vst [vmem:[#allocation5 + $0x28] sm:$0xff] %v156_v4  ;;  %v158_v13 = vadd.f32 %v126_v5, %v389_v17  ;;  %v128_v16 = vmul.f32 %v255_v8, %v395_v21  ;;  %276 = vtanh.f32 %v434_v60 }
  0x2d   :  { %v259_v22 = vpop.eup %258  ;;  %189 = vst [vmem:[#allocation5 + $0x30] sm:$0xff] %v157_v9  ;;  %v159_v15 = vadd.f32 %v127_v10, %v392_v19  ;;  %v129_v24 = vmul.f32 %v257_v14, %v398_v23  ;;  %278 = vtanh.f32 %v439_v1 }
  0x2e   :  { %v261_v30 = vpop.eup %260  ;;  %190 = vst [vmem:[#allocation5 + $0x38] sm:$0xff] %v158_v13  ;;  %v160_v17 = vadd.f32 %v128_v16, %v395_v21  ;;  %v130_v31 = vmul.f32 %v259_v22, %v401_v25  ;;  %280 = vtanh.f32 %v444_v6 }
  0x2f   :  { %v263_v35 = vpop.eup %262  ;;  %191 = vst [vmem:[#allocation5 + $0x40] sm:$0xff] %v159_v15  ;;  %v161_v19 = vadd.f32 %v129_v24, %v398_v23  ;;  %v131_v37 = vmul.f32 %v261_v30, %v404_v27  ;;  %282 = vtanh.f32 %v449_v11 }
  0x30   :  { %v265_v41 = vpop.eup %264  ;;  %192 = vst [vmem:[#allocation5 + $0x48] sm:$0xff] %v160_v17  ;;  %v162_v21 = vadd.f32 %v130_v31, %v401_v25  ;;  %v132_v42 = vmul.f32 %v263_v35, %v407_v29  ;;  %284 = vtanh.f32 %v454_v18 }
  0x31   :  { %v267_v46 = vpop.eup %266  ;;  %193 = vst [vmem:[#allocation5 + $0x50] sm:$0xff] %v161_v19  ;;  %v163_v23 = vadd.f32 %v131_v37, %v404_v27  ;;  %v133_v47 = vmul.f32 %v265_v41, %v410_v32  ;;  %286 = vtanh.f32 %v459_v26 }
  0x32   :  { %v269_v49 = vpop.eup %268  ;;  %194 = vst [vmem:[#allocation5 + $0x58] sm:$0xff] %v162_v21  ;;  %v164_v25 = vadd.f32 %v132_v42, %v407_v29  ;;  %v134_v51 = vmul.f32 %v267_v46, %v413_v36  ;;  %288 = vtanh.f32 %v464_v33 }
  0x33   :  { %v271_v53 = vpop.eup %270  ;;  %195 = vst [vmem:[#allocation5 + $0x60] sm:$0xff] %v163_v23  ;;  %v165_v27 = vadd.f32 %v133_v47, %v410_v32  ;;  %v135_v54 = vmul.f32 %v269_v49, %v416_v40  ;;  %290 = vtanh.f32 %v469_v38 }
  0x34   :  { %v273_v57 = vpop.eup %272  ;;  %196 = vst [vmem:[#allocation5 + $0x68] sm:$0xff] %v164_v25  ;;  %v166_v29 = vadd.f32 %v134_v51, %v413_v36  ;;  %v136_v58 = vmul.f32 %v271_v53, %v420_v45  ;;  %292 = vtanh.f32 %v474_v43 }
  0x35   :  { %v275_v59 = vpop.eup %274  ;;  %197 = vst [vmem:[#allocation5 + $0x70] sm:$0xff] %v165_v27  ;;  %v167_v61 = vadd.f32 %v135_v54, %v416_v40  ;;  %v137_v32 = vmul.f32 %v273_v57, %v424_v50  ;;  %294 = vtanh.f32 %v479_v48 }
  0x36   :  { %v277_v62 = vpop.eup %276  ;;  %198 = vst [vmem:[#allocation5 + $0x78] sm:$0xff] %v166_v29  ;;  %v168_v63 = vadd.f32 %v136_v58, %v420_v45  ;;  %v138_v0 = vmul.f32 %v275_v59, %v429_v55  ;;  %296 = vtanh.f32 %v484_v52 }
  0x37   :  { %v279_v36 = vpop.eup %278  ;;  %199 = vst [vmem:[#allocation5 + $0x80] sm:$0xff] %v167_v61  ;;  %v169_v2 = vadd.f32 %v137_v32, %v424_v50  ;;  %v139_v3 = vmul.f32 %v277_v62, %v434_v60  ;;  %298 = vtanh.f32 %v489_v56 }
  0x38   :  { %v281_v40 = vpop.eup %280  ;;  %200 = vst [vmem:[#allocation5 + $0x88] sm:$0xff] %v168_v63  ;;  %v170_v4 = vadd.f32 %v138_v0, %v429_v55  ;;  %v140_v5 = vmul.f32 %v279_v36, %v439_v1 }
  0x39   :  { %v283_v7 = vpop.eup %282  ;;  %201 = vst [vmem:[#allocation5 + $0x90] sm:$0xff] %v169_v2  ;;  %v171_v45 = vadd.f32 %v139_v3, %v434_v60  ;;  %v141_v8 = vmul.f32 %v281_v40, %v444_v6 }
  0x3a   :  { %v285_v9 = vpop.eup %284  ;;  %202 = vst [vmem:[#allocation5 + $0x98] sm:$0xff] %v170_v4  ;;  %v172_v50 = vadd.f32 %v140_v5, %v439_v1  ;;  %v142_v10 = vmul.f32 %v283_v7, %v449_v11 }
  0x3b   :  { %v287_v12 = vpop.eup %286  ;;  %203 = vst [vmem:[#allocation5 + $0xa0] sm:$0xff] %v171_v45  ;;  %v173_v14 = vadd.f32 %v141_v8, %v444_v6  ;;  %v143_v55 = vmul.f32 %v285_v9, %v454_v18 }
  0x3c   :  { %v289_v13 = vpop.eup %288  ;;  %204 = vst [vmem:[#allocation5 + $0xa8] sm:$0xff] %v172_v50  ;;  %v174_v16 = vadd.f32 %v142_v10, %v449_v11  ;;  %v144_v60 = vmul.f32 %v287_v12, %v459_v26 }
  0x3d   :  { %v291_v20 = vpop.eup %290  ;;  %205 = vst [vmem:[#allocation5 + $0xb0] sm:$0xff] %v173_v14  ;;  %v175_v22 = vadd.f32 %v143_v55, %v454_v18  ;;  %v145_v1 = vmul.f32 %v289_v13, %v464_v33 }
  0x3e   :  { %v293_v15 = vpop.eup %292  ;;  %206 = vst [vmem:[#allocation5 + $0xb8] sm:$0xff] %v174_v16  ;;  %v176_v24 = vadd.f32 %v144_v60, %v459_v26  ;;  %v146_v6 = vmul.f32 %v291_v20, %v469_v38 }
  0x3f   :  { %v295_v28 = vpop.eup %294  ;;  %207 = vst [vmem:[#allocation5 + $0xc0] sm:$0xff] %v175_v22  ;;  %v177_v30 = vadd.f32 %v145_v1, %v464_v33  ;;  %v147_v11 = vmul.f32 %v293_v15, %v474_v43 }
  0x40   :  { %v297_v17 = vpop.eup %296  ;;  %208 = vst [vmem:[#allocation5 + $0xc8] sm:$0xff] %v176_v24  ;;  %v178_v31 = vadd.f32 %v146_v6, %v469_v38  ;;  %v148_v18 = vmul.f32 %v295_v28, %v479_v48 }
  0x41   :  { %v299_v34 = vpop.eup %298  ;;  %209 = vst [vmem:[#allocation5 + $0xd0] sm:$0xff] %v177_v30  ;;  %v179_v35 = vadd.f32 %v147_v11, %v474_v43  ;;  %v149_v26 = vmul.f32 %v297_v17, %v484_v52 }
  0x42   :  { %210 = vst [vmem:[#allocation5 + $0xd8] sm:$0xff] %v178_v31  ;;  %v180_v19 = vadd.f32 %v148_v18, %v479_v48  ;;  %v150_v37 = vmul.f32 %v299_v34, %v489_v56 }
  0x43   :  { %211 = vst [vmem:[#allocation5 + $0xe0] sm:$0xff] %v179_v35  ;;  %v181_v33 = vadd.f32 %v149_v26, %v484_v52 }
  0x44   :  { %212 = vst [vmem:[#allocation5 + $0xe8] sm:$0xff] %v180_v19  ;;  %v182_v39 = vadd.f32 %v150_v37, %v489_v56 }
  0x45   :  { %213 = vst [vmem:[#allocation5 + $0xf0] sm:$0xff] %v181_v33 }
  0x46   :  { %214 = vst [vmem:[#allocation5 + $0xf8] sm:$0xff] %v182_v39 }
  0x47   :  { %219 = vsyncadd [#allocation4], 3840  ;;  %s351_s0 = smov [#allocation5]  }
  0x48   :  { %s220_s21 = sshll.u32 %s351_s0, 4  ;;  %s221_s21 = int_to_ptr.vmem [resolvable:$true] %s220_s21 }
  0x49   :  { %s322_s22 = scalar_lea.vmem %s221_s21, 256  ;;  %s326_s23 = scalar_lea.vmem %s221_s21, 4096 }
  0x4a   :  { %p323_p8 = scmp.ne.s32.totalorder %s221_s21, %s322_s22  ;;  %p327_p9 = scmp.lt.s32.totalorder %s221_s21, %s221_s21 }
  0x4b   :  { %p328_p10 = scmp.lt.s32.totalorder %s326_s23, %s322_s22 }
  0x4d   :  { %p329_p11 = por %p328_p10, %p327_p9 }
  0x4f   :  { %p330_p12 = pnand %p329_p11, %p323_p8 }
  0x51   :  { %333 = shalt.err (!%p330_p12)
}
  0x52   :  { %s334_s26 = scalar_lea.hbm %s543_s1, 256 }
  0x53   :  { %p335_p13 = scmp.ne.s32.totalorder %s543_s1, %s334_s26  ;;  %p338_p0 = scmp.lt.u32.totalorder %s334_s26, %s543_s1 }
  0x55   :  { %p340_p1 = pnand %p338_p0, %p335_p13 }
  0x57   :  { %343 = shalt.err (!%p340_p1)
}
  0x58   :  { %226 = dma.vmem_to_hbm [thread:$0]  %s221_s21, 256, %s543_s1, [#allocation4], %s349_s17, %s349_s17, %s350_s18  }
  0x59   :  { %346 = dma.done.wait [#allocation4], 4096  }
  0x5a   :  { %347 = vsyncadd [#allocation4], 4294963200 }
  0x5b   :  { %230 = vsyncpa [#allocation3], 1 }
  0x5c   :  { %231 = vsyncpa [#allocation4], 1 }

</bundles_post_ra>
